<compile_context>
chip_gen: v7x
topology: tpu7x:2x2x1
jax: 0.10.0
libtpu: 0.0.40
codegen_flags: <defaults>
</compile_context>

<pallas_src>
import jax
import jax.numpy as jnp
import numpy as np
from jax.experimental import pallas as pl
from jax.experimental.pallas import tpu as pltpu

# ----- model hyperparameters (small, consistent with the module) -----
B = 2               # batch (slides)
S = 8               # sequence length (tiles per slide)
D = 32              # d_features
HIDDEN = 32         # hidden_dim == kdim == vdim
NUM_HEADS = 4
DK = HIDDEN // NUM_HEADS     # per-head key dim
DV = HIDDEN // NUM_HEADS     # per-head value dim
N_CLASSES = 3       # categorical target "subtype"
N_OUT = N_CLASSES + 1        # fused heads: [subtype(3) | survival(1)]
N_OUT_PAD = 128              # lane-dense output slab width
QKV_DIM = 3 * HIDDEN         # 96 live QKV columns
QKV_PAD = 128                # lane-tile-aligned offset of the head weights in the slab
W_SLAB = QKV_PAD + N_OUT_PAD # fused weight slab width (256)
LN_EPS = 1e-5


def mil_kernel(x_ref, w_ref, vec_ref, out_ref):
    """LayerNorm -> batched MHA (no out-proj) -> max-agg -> fused linear heads.

    x_ref  : (B*S, D)     flattened tile tokens
    w_ref  : (D, 256)     fused weights: cols [0:96)=[Wq*scale|Wk|Wv], [128:256)=head W (lane-padded)
    vec_ref: (3, 128)     rows: [ln_gamma pad | ln_beta pad | fused head bias pad]
    out_ref: (B, 128)     lane-dense output slab [subtype(3) | survival(1) | 0 pad]
    """
    x = x_ref[...]                                                    # (B*S, D)
    vec = vec_ref[...]                                                # (3, 128)
    gamma = vec[0:1, 0:D]                                             # (1, D)
    beta = vec[1:2, 0:D]                                              # (1, D)
    bias = vec[2:3, :]                                                # (1, 128)

    # --- LayerNorm over the feature dim (whole batch at once) ---
    mu = jnp.mean(x, axis=-1, keepdims=True)
    var = jnp.mean((x - mu) ** 2, axis=-1, keepdims=True)
    xn = (x - mu) * jax.lax.rsqrt(var + LN_EPS)
    xn = xn * gamma + beta

    # --- ONE wide fused-QKV matmul (softmax scale already folded into Wq cols) ---
    qkv = jnp.dot(xn, w_ref[:, 0:QKV_PAD],
                  preferred_element_type=jnp.float32)                 # (B*S, 128)
    qkv = qkv.reshape(B, S, QKV_PAD)                                  # free sublane split (16 -> 2x8)

    # heads go into the leading batch dim only now (cheap static lane slices)
    def split_heads(base):
        blocks = [qkv[:, :, base + h * DK: base + (h + 1) * DK]       # (B, S, DK)
                  for h in range(NUM_HEADS)]
        return jnp.stack(blocks, axis=0).reshape(NUM_HEADS * B, S, DK)

    q = split_heads(0)
    k = split_heads(HIDDEN)
    v = split_heads(2 * HIDDEN)

    # --- (NH*B)-batched scaled dot-product attention, single MXU contractions ---
    logits = jnp.einsum('bqd,bkd->bqk', q, k,
                        preferred_element_type=jnp.float32)           # (NH*B, S, S)
    m = jnp.max(logits, axis=-1, keepdims=True)
    p = jnp.exp(logits - m)
    l = jnp.sum(p, axis=-1, keepdims=True)
    # EUP reciprocal + one Newton step: keeps fp32 accuracy, avoids the VPU divide
    inv_l = pl.reciprocal(l, approx=True)
    inv_l = inv_l * (2.0 - l * inv_l)
    attn = p * inv_l
    o = jnp.einsum('bqk,bkd->bqd', attn, v,
                   preferred_element_type=jnp.float32)                # (NH*B, S, DV)

    # --- concat heads along lanes, max over tiles, stack slides -> one head matmul ---
    slides = []
    for b in range(B):                                                # static 2-iter unroll
        ob = jnp.concatenate([o[h * B + b] for h in range(NUM_HEADS)],
                             axis=-1)                                 # (S, HIDDEN)
        slides.append(jnp.max(ob, axis=0, keepdims=True))             # (1, HIDDEN)
    slide = jnp.concatenate(slides, axis=0)                           # (B, HIDDEN)

    # single fused target-head matmul + bias, lane-dense (unmasked) store
    out_ref[...] = (jnp.dot(slide, w_ref[:, QKV_PAD:W_SLAB],
                            preferred_element_type=jnp.float32) + bias)


def pack_params(params):
    """Fuse all weights/biases into two DMA-friendly slabs. Call ONCE, outside the hot path."""
    assert D == HIDDEN, "single (D, 256) weight slab relies on D == HIDDEN"
    scale = 1.0 / (DK ** 0.5)
    wqkv = jnp.concatenate([params['wq'] * scale,                     # scale folded into Wq
                            params['wk'],
                            params['wv']], axis=-1)                   # (D, 96)
    w_heads = jnp.concatenate([params['w_cat'], params['w_cont']], axis=-1)  # (HIDDEN, 4)

    w_slab = jnp.zeros((D, W_SLAB), jnp.float32)
    w_slab = w_slab.at[:, :QKV_DIM].set(wqkv)
    w_slab = w_slab.at[:, QKV_PAD:QKV_PAD + N_OUT].set(w_heads)

    b_all = jnp.concatenate([params['b_cat'], params['b_cont']], axis=-1)[0]  # (4,)
    vec_slab = jnp.zeros((3, N_OUT_PAD), jnp.float32)
    vec_slab = vec_slab.at[0, :D].set(params['ln_g'][0])
    vec_slab = vec_slab.at[1, :D].set(params['ln_b'][0])
    vec_slab = vec_slab.at[2, :N_OUT].set(b_all)
    return w_slab, vec_slab


@jax.jit
def mil_transformer_forward(x, w_slab, vec_slab):
    """x: (B, S, D) float32. Returns {'subtype': (B, 3), 'survival': (B,)}."""
    Bn, Sn, Dn = x.shape
    assert (Bn, Sn, Dn) == (B, S, D)
    out = pl.pallas_call(
        mil_kernel,
        out_shape=jax.ShapeDtypeStruct((Bn, N_OUT_PAD), jnp.float32),
        in_specs=[pl.BlockSpec(memory_space=pltpu.MemorySpace.VMEM),
                  pl.BlockSpec(memory_space=pltpu.MemorySpace.VMEM),
                  pl.BlockSpec(memory_space=pltpu.MemorySpace.VMEM)],
        out_specs=pl.BlockSpec(memory_space=pltpu.MemorySpace.VMEM),
    )(x.reshape(Bn * Sn, Dn), w_slab, vec_slab)
    return {
        'subtype': out[:, :N_CLASSES],     # (B, 3)
        'survival': out[:, N_CLASSES],     # (B,)
    }


def reference_forward(x, params):
    """Pure-JAX reference for numeric checking (unpacked weights)."""
    mu = jnp.mean(x, axis=-1, keepdims=True)
    var = jnp.mean((x - mu) ** 2, axis=-1, keepdims=True)
    xn = (x - mu) / jnp.sqrt(var + LN_EPS) * params["ln_g"][0] + params["ln_b"][0]
    q = xn @ params["wq"]
    k = xn @ params["wk"]
    v = xn @ params["wv"]
    qh = q.reshape(B, S, NUM_HEADS, DK).transpose(0, 2, 1, 3)
    kh = k.reshape(B, S, NUM_HEADS, DK).transpose(0, 2, 1, 3)
    vh = v.reshape(B, S, NUM_HEADS, DV).transpose(0, 2, 1, 3)
    logits = jnp.einsum("bhqd,bhkd->bhqk", qh, kh) / (DK ** 0.5)
    attn = jax.nn.softmax(logits, axis=-1)
    out = jnp.einsum("bhqk,bhkd->bhqd", attn, vh).transpose(0, 2, 1, 3).reshape(B, S, HIDDEN)
    slide = out.max(axis=-2)
    cat = slide @ params["w_cat"] + params["b_cat"][0]
    cont = (slide @ params["w_cont"] + params["b_cont"][0]).squeeze(-1)
    return {"subtype": cat, "survival": cont}


def init_params(key):
    ks = jax.random.split(key, 8)

    def xavier(k, fan_in, fan_out):
        a = float(np.sqrt(6.0 / (fan_in + fan_out)))
        return jax.random.uniform(k, (fan_in, fan_out), jnp.float32, -a, a)

    def head(kw, kb, fan_in, fan_out):
        a = 1.0 / float(np.sqrt(fan_in))
        w = jax.random.uniform(kw, (fan_in, fan_out), jnp.float32, -a, a)
        b = jax.random.uniform(kb, (1, fan_out), jnp.float32, -a, a)
        return w, b

    w_cat, b_cat = head(ks[3], ks[4], HIDDEN, N_CLASSES)
    w_cont, b_cont = head(ks[5], ks[6], HIDDEN, 1)
    return {
        # LayerNorm params (default init: gamma=1, beta=0)
        "ln_g": jnp.ones((1, D), jnp.float32),
        "ln_b": jnp.zeros((1, D), jnp.float32),
        # q/k/v projections, stored pre-transposed as (in, out) so q = x @ Wq
        "wq": xavier(ks[0], D, HIDDEN),
        "wk": xavier(ks[1], D, HIDDEN),
        "wv": xavier(ks[2], D, HIDDEN),
        # target heads
        "w_cat": w_cat, "b_cat": b_cat,
        "w_cont": w_cont, "b_cont": b_cont,
    }


if __name__ == "__main__":
    key = jax.random.PRNGKey(0)
    k_x, k_p = jax.random.split(key)
    tile_tokens = jax.random.normal(k_x, (B, S, D), jnp.float32)
    params = init_params(k_p)

    # weight packing happens once, outside the (jitted) hot path
    w_slab, vec_slab = pack_params(params)
    jax.block_until_ready((w_slab, vec_slab))

    logits = mil_transformer_forward(tile_tokens, w_slab, vec_slab)
    jax.block_until_ready(logits)

    ref = reference_forward(tile_tokens, params)
    # 1e-4 tolerance: Newton-refined EUP reciprocal + MXU f32 rounding.
    np.testing.assert_allclose(np.asarray(logits["subtype"]),
                               np.asarray(ref["subtype"]), rtol=1e-4, atol=1e-4)
    np.testing.assert_allclose(np.asarray(logits["survival"]),
                               np.asarray(ref["survival"]), rtol=1e-4, atol=1e-4)
    print("KERNEL_OK")
</pallas_src>

<mosaic_0001>
module attributes {stable_mosaic.version = 11 : i64} {
  func.func @mil_kernel(%arg0: memref<16x32xf32, #tpu.memory_space<vmem>>, %arg1: memref<32x256xf32, #tpu.memory_space<vmem>>, %arg2: memref<3x128xf32, #tpu.memory_space<vmem>>, %arg3: memref<2x128xf32, #tpu.memory_space<vmem>>) attributes {dimension_semantics = [], scalar_prefetch = 0 : i64, scratch_operands = 0 : i64, tpu.core_type = #tpu.core_type<tc>} {
    %c0 = arith.constant 0 : index
    %c0_0 = arith.constant 0 : index
    %0 = vector.load %arg0[%c0, %c0_0] : memref<16x32xf32, #tpu.memory_space<vmem>>, vector<16x32xf32>
    %c0_1 = arith.constant 0 : index
    %c0_2 = arith.constant 0 : index
    %1 = vector.load %arg2[%c0_1, %c0_2] : memref<3x128xf32, #tpu.memory_space<vmem>>, vector<3x128xf32>
    %2 = vector.extract_strided_slice %1 {offsets = [0, 0], sizes = [1, 32], strides = [1, 1]} : vector<3x128xf32> to vector<1x32xf32>
    %3 = vector.extract_strided_slice %1 {offsets = [1, 0], sizes = [1, 32], strides = [1, 1]} : vector<3x128xf32> to vector<1x32xf32>
    %4 = vector.extract_strided_slice %1 {offsets = [2, 0], sizes = [1, 128], strides = [1, 1]} : vector<3x128xf32> to vector<1x128xf32>
    %cst = arith.constant dense<0.000000e+00> : vector<16xf32>
    %5 = vector.multi_reduction <add>, %0, %cst [1] : vector<16x32xf32> to vector<16xf32>
    %6 = vector.shape_cast %5 : vector<16xf32> to vector<16x1xf32>
    %cst_3 = arith.constant 3.200000e+01 : f32
    %7 = vector.broadcast %cst_3 : f32 to vector<16x1xf32>
    %8 = arith.divf %6, %7 : vector<16x1xf32>
    %9 = vector.broadcast %8 : vector<16x1xf32> to vector<16x32xf32>
    %10 = arith.subf %0, %9 : vector<16x32xf32>
    %11 = arith.mulf %10, %10 : vector<16x32xf32>
    %cst_4 = arith.constant dense<0.000000e+00> : vector<16xf32>
    %12 = vector.multi_reduction <add>, %11, %cst_4 [1] : vector<16x32xf32> to vector<16xf32>
    %13 = vector.shape_cast %12 : vector<16xf32> to vector<16x1xf32>
    %cst_5 = arith.constant 3.200000e+01 : f32
    %14 = vector.broadcast %cst_5 : f32 to vector<16x1xf32>
    %15 = arith.divf %13, %14 : vector<16x1xf32>
    %16 = vector.broadcast %8 : vector<16x1xf32> to vector<16x32xf32>
    %17 = arith.subf %0, %16 : vector<16x32xf32>
    %cst_6 = arith.constant 9.99999974E-6 : f32
    %18 = vector.broadcast %cst_6 : f32 to vector<16x1xf32>
    %19 = arith.addf %15, %18 : vector<16x1xf32>
    %20 = math.rsqrt %19 : vector<16x1xf32>
    %21 = vector.broadcast %20 : vector<16x1xf32> to vector<16x32xf32>
    %22 = arith.mulf %17, %21 : vector<16x32xf32>
    %23 = vector.broadcast %2 : vector<1x32xf32> to vector<16x32xf32>
    %24 = arith.mulf %22, %23 : vector<16x32xf32>
    %25 = vector.broadcast %3 : vector<1x32xf32> to vector<16x32xf32>
    %26 = arith.addf %24, %25 : vector<16x32xf32>
    %c0_7 = arith.constant 0 : index
    %c0_8 = arith.constant 0 : index
    %27 = vector.load %arg1[%c0_7, %c0_8] : memref<32x256xf32, #tpu.memory_space<vmem>>, vector<32x128xf32>
    %cst_9 = arith.constant dense<0.000000e+00> : vector<16x128xf32>
    %28 = tpu.matmul %26, %27, %cst_9 {dimension_numbers = #tpu.dot_dimension_numbers<[1], [0], [0], [1], [0, 0, 1, 1], [], []>} : vector<16x32xf32>, vector<32x128xf32>, vector<16x128xf32> -> vector<16x128xf32>
    %29 = vector.shape_cast %28 : vector<16x128xf32> to vector<2x8x128xf32>
    %30 = vector.extract_strided_slice %29 {offsets = [0, 0, 0], sizes = [2, 8, 8], strides = [1, 1, 1]} : vector<2x8x128xf32> to vector<2x8x8xf32>
    %31 = vector.extract_strided_slice %29 {offsets = [0, 0, 8], sizes = [2, 8, 8], strides = [1, 1, 1]} : vector<2x8x128xf32> to vector<2x8x8xf32>
    %32 = vector.extract_strided_slice %29 {offsets = [0, 0, 16], sizes = [2, 8, 8], strides = [1, 1, 1]} : vector<2x8x128xf32> to vector<2x8x8xf32>
    %33 = vector.extract_strided_slice %29 {offsets = [0, 0, 24], sizes = [2, 8, 8], strides = [1, 1, 1]} : vector<2x8x128xf32> to vector<2x8x8xf32>
    %34 = vector.shape_cast %30 : vector<2x8x8xf32> to vector<1x2x8x8xf32>
    %35 = vector.shape_cast %31 : vector<2x8x8xf32> to vector<1x2x8x8xf32>
    %36 = vector.shape_cast %32 : vector<2x8x8xf32> to vector<1x2x8x8xf32>
    %37 = vector.shape_cast %33 : vector<2x8x8xf32> to vector<1x2x8x8xf32>
    %38 = tpu.concatenate %34, %35, %36, %37 in 0 : vector<1x2x8x8xf32>, vector<1x2x8x8xf32>, vector<1x2x8x8xf32>, vector<1x2x8x8xf32> -> vector<4x2x8x8xf32>
    %39 = vector.shape_cast %38 : vector<4x2x8x8xf32> to vector<8x8x8xf32>
    %40 = vector.extract_strided_slice %29 {offsets = [0, 0, 32], sizes = [2, 8, 8], strides = [1, 1, 1]} : vector<2x8x128xf32> to vector<2x8x8xf32>
    %41 = vector.extract_strided_slice %29 {offsets = [0, 0, 40], sizes = [2, 8, 8], strides = [1, 1, 1]} : vector<2x8x128xf32> to vector<2x8x8xf32>
    %42 = vector.extract_strided_slice %29 {offsets = [0, 0, 48], sizes = [2, 8, 8], strides = [1, 1, 1]} : vector<2x8x128xf32> to vector<2x8x8xf32>
    %43 = vector.extract_strided_slice %29 {offsets = [0, 0, 56], sizes = [2, 8, 8], strides = [1, 1, 1]} : vector<2x8x128xf32> to vector<2x8x8xf32>
    %44 = vector.shape_cast %40 : vector<2x8x8xf32> to vector<1x2x8x8xf32>
    %45 = vector.shape_cast %41 : vector<2x8x8xf32> to vector<1x2x8x8xf32>
    %46 = vector.shape_cast %42 : vector<2x8x8xf32> to vector<1x2x8x8xf32>
    %47 = vector.shape_cast %43 : vector<2x8x8xf32> to vector<1x2x8x8xf32>
    %48 = tpu.concatenate %44, %45, %46, %47 in 0 : vector<1x2x8x8xf32>, vector<1x2x8x8xf32>, vector<1x2x8x8xf32>, vector<1x2x8x8xf32> -> vector<4x2x8x8xf32>
    %49 = vector.shape_cast %48 : vector<4x2x8x8xf32> to vector<8x8x8xf32>
    %50 = vector.extract_strided_slice %29 {offsets = [0, 0, 64], sizes = [2, 8, 8], strides = [1, 1, 1]} : vector<2x8x128xf32> to vector<2x8x8xf32>
    %51 = vector.extract_strided_slice %29 {offsets = [0, 0, 72], sizes = [2, 8, 8], strides = [1, 1, 1]} : vector<2x8x128xf32> to vector<2x8x8xf32>
    %52 = vector.extract_strided_slice %29 {offsets = [0, 0, 80], sizes = [2, 8, 8], strides = [1, 1, 1]} : vector<2x8x128xf32> to vector<2x8x8xf32>
    %53 = vector.extract_strided_slice %29 {offsets = [0, 0, 88], sizes = [2, 8, 8], strides = [1, 1, 1]} : vector<2x8x128xf32> to vector<2x8x8xf32>
    %54 = vector.shape_cast %50 : vector<2x8x8xf32> to vector<1x2x8x8xf32>
    %55 = vector.shape_cast %51 : vector<2x8x8xf32> to vector<1x2x8x8xf32>
    %56 = vector.shape_cast %52 : vector<2x8x8xf32> to vector<1x2x8x8xf32>
    %57 = vector.shape_cast %53 : vector<2x8x8xf32> to vector<1x2x8x8xf32>
    %58 = tpu.concatenate %54, %55, %56, %57 in 0 : vector<1x2x8x8xf32>, vector<1x2x8x8xf32>, vector<1x2x8x8xf32>, vector<1x2x8x8xf32> -> vector<4x2x8x8xf32>
    %59 = vector.shape_cast %58 : vector<4x2x8x8xf32> to vector<8x8x8xf32>
    "tpu.trace_start"() <{level = 10 : i32, message = "bqd,bkd->bqk"}> : () -> ()
    %cst_10 = arith.constant dense<0.000000e+00> : vector<8x8x8xf32>
    %60 = tpu.matmul %39, %49, %cst_10 {dimension_numbers = #tpu.dot_dimension_numbers<[2], [2], [1], [1], [0, 0, 0, 1, 1, 1], [0], [0]>} : vector<8x8x8xf32>, vector<8x8x8xf32>, vector<8x8x8xf32> -> vector<8x8x8xf32>
    "tpu.trace_stop"() : () -> ()
    %cst_11 = arith.constant dense<0xFF800000> : vector<8x8xf32>
    %61 = vector.multi_reduction <maximumf>, %60, %cst_11 [2] : vector<8x8x8xf32> to vector<8x8xf32>
    %62 = vector.shape_cast %61 : vector<8x8xf32> to vector<8x8x1xf32>
    %63 = vector.broadcast %62 : vector<8x8x1xf32> to vector<8x8x8xf32>
    %64 = arith.subf %60, %63 : vector<8x8x8xf32>
    %65 = math.exp %64 : vector<8x8x8xf32>
    %cst_12 = arith.constant dense<0.000000e+00> : vector<8x8xf32>
    %66 = vector.multi_reduction <add>, %65, %cst_12 [2] : vector<8x8x8xf32> to vector<8x8xf32>
    %67 = vector.shape_cast %66 : vector<8x8xf32> to vector<8x8x1xf32>
    %68 = tpu.reciprocal %67 {approx = true} : vector<8x8x1xf32> -> vector<8x8x1xf32>
    %69 = arith.mulf %67, %68 : vector<8x8x1xf32>
    %cst_13 = arith.constant 2.000000e+00 : f32
    %70 = vector.broadcast %cst_13 : f32 to vector<8x8x1xf32>
    %71 = arith.subf %70, %69 : vector<8x8x1xf32>
    %72 = arith.mulf %68, %71 : vector<8x8x1xf32>
    %73 = vector.broadcast %72 : vector<8x8x1xf32> to vector<8x8x8xf32>
    %74 = arith.mulf %65, %73 : vector<8x8x8xf32>
    "tpu.trace_start"() <{level = 10 : i32, message = "bqk,bkd->bqd"}> : () -> ()
    %cst_14 = arith.constant dense<0.000000e+00> : vector<8x8x8xf32>
    %75 = tpu.matmul %74, %59, %cst_14 {dimension_numbers = #tpu.dot_dimension_numbers<[2], [1], [1], [2], [0, 0, 0, 1, 1, 2], [0], [0]>} : vector<8x8x8xf32>, vector<8x8x8xf32>, vector<8x8x8xf32> -> vector<8x8x8xf32>
    "tpu.trace_stop"() : () -> ()
    %76 = vector.extract_strided_slice %75 {offsets = [0, 0, 0], sizes = [1, 8, 8], strides = [1, 1, 1]} : vector<8x8x8xf32> to vector<1x8x8xf32>
    %77 = vector.shape_cast %76 : vector<1x8x8xf32> to vector<8x8xf32>
    %78 = vector.extract_strided_slice %75 {offsets = [2, 0, 0], sizes = [1, 8, 8], strides = [1, 1, 1]} : vector<8x8x8xf32> to vector<1x8x8xf32>
    %79 = vector.shape_cast %78 : vector<1x8x8xf32> to vector<8x8xf32>
    %80 = vector.extract_strided_slice %75 {offsets = [4, 0, 0], sizes = [1, 8, 8], strides = [1, 1, 1]} : vector<8x8x8xf32> to vector<1x8x8xf32>
    %81 = vector.shape_cast %80 : vector<1x8x8xf32> to vector<8x8xf32>
    %82 = vector.extract_strided_slice %75 {offsets = [6, 0, 0], sizes = [1, 8, 8], strides = [1, 1, 1]} : vector<8x8x8xf32> to vector<1x8x8xf32>
    %83 = vector.shape_cast %82 : vector<1x8x8xf32> to vector<8x8xf32>
    %84 = tpu.concatenate %77, %79, %81, %83 in 1 : vector<8x8xf32>, vector<8x8xf32>, vector<8x8xf32>, vector<8x8xf32> -> vector<8x32xf32>
    %cst_15 = arith.constant dense<0xFF800000> : vector<32xf32>
    %85 = vector.multi_reduction <maximumf>, %84, %cst_15 [0] : vector<8x32xf32> to vector<32xf32>
    %86 = vector.shape_cast %85 : vector<32xf32> to vector<1x32xf32>
    %87 = vector.extract_strided_slice %75 {offsets = [1, 0, 0], sizes = [1, 8, 8], strides = [1, 1, 1]} : vector<8x8x8xf32> to vector<1x8x8xf32>
    %88 = vector.shape_cast %87 : vector<1x8x8xf32> to vector<8x8xf32>
    %89 = vector.extract_strided_slice %75 {offsets = [3, 0, 0], sizes = [1, 8, 8], strides = [1, 1, 1]} : vector<8x8x8xf32> to vector<1x8x8xf32>
    %90 = vector.shape_cast %89 : vector<1x8x8xf32> to vector<8x8xf32>
    %91 = vector.extract_strided_slice %75 {offsets = [5, 0, 0], sizes = [1, 8, 8], strides = [1, 1, 1]} : vector<8x8x8xf32> to vector<1x8x8xf32>
    %92 = vector.shape_cast %91 : vector<1x8x8xf32> to vector<8x8xf32>
    %93 = vector.extract_strided_slice %75 {offsets = [7, 0, 0], sizes = [1, 8, 8], strides = [1, 1, 1]} : vector<8x8x8xf32> to vector<1x8x8xf32>
    %94 = vector.shape_cast %93 : vector<1x8x8xf32> to vector<8x8xf32>
    %95 = tpu.concatenate %88, %90, %92, %94 in 1 : vector<8x8xf32>, vector<8x8xf32>, vector<8x8xf32>, vector<8x8xf32> -> vector<8x32xf32>
    %cst_16 = arith.constant dense<0xFF800000> : vector<32xf32>
    %96 = vector.multi_reduction <maximumf>, %95, %cst_16 [0] : vector<8x32xf32> to vector<32xf32>
    %97 = vector.shape_cast %96 : vector<32xf32> to vector<1x32xf32>
    %98 = tpu.concatenate %86, %97 in 0 : vector<1x32xf32>, vector<1x32xf32> -> vector<2x32xf32>
    %c0_17 = arith.constant 0 : index
    %c128 = arith.constant 128 : index
    %99 = vector.load %arg1[%c0_17, %c128] : memref<32x256xf32, #tpu.memory_space<vmem>>, vector<32x128xf32>
    %cst_18 = arith.constant dense<0.000000e+00> : vector<2x128xf32>
    %100 = tpu.matmul %98, %99, %cst_18 {dimension_numbers = #tpu.dot_dimension_numbers<[1], [0], [0], [1], [0, 0, 1, 1], [], []>} : vector<2x32xf32>, vector<32x128xf32>, vector<2x128xf32> -> vector<2x128xf32>
    %101 = vector.broadcast %4 : vector<1x128xf32> to vector<2x128xf32>
    %102 = arith.addf %100, %101 : vector<2x128xf32>
    %c0_19 = arith.constant 0 : index
    %c0_20 = arith.constant 0 : index
    %103 = vector.load %arg3[%c0_19, %c0_20] : memref<2x128xf32, #tpu.memory_space<vmem>>, vector<2x128xf32>
    tpu.vector_store %arg3[%c0_19, %c0_20], %102 {strides = array<i32>} : memref<2x128xf32, #tpu.memory_space<vmem>>, vector<2x128xf32>,
    return
  }
}

</mosaic_0001>

<bundles_post_ra>
// kernel: mil_transformer_forward.1
= control target key start
LH: loop header
LB: loop body
LE: loop exit
PB: predicated region body
PF: predicated region fallthrough
CT: control target
= control target key end

     0   :  { %8 = vsyncpa [#allocation3], 0  ;;  %s2205_s0 = inlined_call_operand.hbm [shape: f32[16,32], index: 0, kind: input, shape index: {}]   ;;  %s2206_s1 = inlined_call_operand.hbm [shape: f32[32,256], index: 1, kind: input, shape index: {}]   ;;  %s2207_s2 = inlined_call_operand.vmem [shape: f32[3,128], index: 2, kind: input, shape index: {}]   ;;  %s2208_s3 = inlined_call_operand.vmem [shape: f32[2,128], index: 3, kind: output, shape index: {}]  }
   0x1   :  { %9 = vsyncpa [#allocation5], 0  ;;  %s1934_s12 = smov [#allocation2]   ;;  %s1886_s16 = scalar_lea.hbm %s2205_s0, 256 }
   0x2   :  { %s15_s13 = sshll.u32 %s1934_s12, 4  ;;  %p1887_p0 = scmp.ne.s32.totalorder %s2205_s0, %s1886_s16  ;;  %s16_s13 = int_to_ptr.vmem [resolvable:$true] %s15_s13 }
   0x3   :  { %p1890_p1 = scmp.lt.u32.totalorder %s1886_s16, %s2205_s0 }
   0x5   :  { %p1892_p2 = pnand %p1890_p1, %p1887_p0 }
   0x7   :  { %1895 = shalt.err (!%p1892_p2)
}
   0x8   :  { %s1896_s21 = scalar_lea.vmem %s16_s13, 256  ;;  %p1901_p4 = scmp.lt.s32.totalorder %s16_s13, %s16_s13 }
   0x9   :  { %p1897_p3 = scmp.ne.s32.totalorder %s16_s13, %s1896_s21  ;;  %p1902_p5 = scmp.lt.s32.totalorder %s1896_s21, %s1896_s21 }
   0xb   :  { %p1903_p6 = por %p1902_p5, %p1901_p4 }
   0xd   :  { %p1904_p7 = pnand %p1903_p6, %p1897_p3 }
   0xf   :  { %1907 = shalt.err (!%p1904_p7)
}
  0x10   :  { %s1935_s22 = smov 128   ;;  %s1936_s23 = smov 8  }
  0x11   :  { %21 = dma.hbm_to_vmem [thread:$0]  %s2205_s0, 256, %s16_s13, [#allocation3], %s1935_s22, %s1935_s22, %s1936_s23  }
  0x12   :  { %s1937_s26 = smov [#allocation4]   ;;  %s1908_s30 = scalar_lea.hbm %s2206_s1, 1024 }
  0x13   :  { %s27_s27 = sshll.u32 %s1937_s26, 4  ;;  %p1909_p8 = scmp.ne.s32.totalorder %s2206_s1, %s1908_s30  ;;  %s28_s27 = int_to_ptr.vmem [resolvable:$true] %s27_s27 }
  0x14   :  { %p1912_p9 = scmp.lt.u32.totalorder %s1908_s30, %s2206_s1 }
  0x16   :  { %p1914_p10 = pnand %p1912_p9, %p1909_p8 }
  0x18   :  { %1917 = shalt.err (!%p1914_p10)
}
  0x19   :  { %s1918_s8 = scalar_lea.vmem %s28_s27, 1024  ;;  %p1923_p12 = scmp.lt.s32.totalorder %s28_s27, %s28_s27 }
  0x1a   :  { %p1919_p11 = scmp.ne.s32.totalorder %s28_s27, %s1918_s8  ;;  %p1924_p13 = scmp.lt.s32.totalorder %s1918_s8, %s1918_s8 }
  0x1c   :  { %p1925_p0 = por %p1924_p13, %p1923_p12 }
  0x1e   :  { %p1926_p1 = pnand %p1925_p0, %p1919_p11 }
  0x20   :  { %1929 = shalt.err (!%p1926_p1)
}
  0x21   :  { %s1938_s0 = smov 256   ;;  %s1939_s9 = smov 16  }
  0x22   :  { %33 = dma.hbm_to_vmem [thread:$0]  %s2206_s1, 1024, %s28_s27, [#allocation5], %s1938_s0, %s1938_s0, %s1939_s9  }
  0x23   :  { %1930 = dma.done.wait [#allocation3], 256  }
  0x24   :  { %1931 = vsyncadd [#allocation3], 4294967040 }
  0x25   :  { %1932 = dma.done.wait [#allocation5], 1024  }
  0x26   :  { %1933 = vsyncadd [#allocation5], 4294966272  ;;  %vm45_vm0 = vcmask 261120   ;;  %v42_v0 = vld [vmem:[#allocation2] sm:$0xff]  ;;  %v43_v1 = vld [vmem:[#allocation2 + $0x8] sm:$0xff]  ;;  %v73_v22 = vlaneseq  ;;  %v1940_v41 = vmov 0.0  }
  0x27   :  { %v46_v2 = vsel %vm45_vm0, %v42_v0, 0.0  ;;  %v49_v3 = vsel %vm45_vm0, %v43_v1, 0.0  ;;  %v85_v14 = vld [vmem:[#allocation4] sm:$0xff]  ;;  %v86_v15 = vld [vmem:[#allocation4 + $0x10] sm:$0xff]  ;;  %1730 = vmatprep.subr.mxu1 %v1940_v41  ;;  %vm1941_vm1 = vmmov 0   ;;  %s1943_s13 = smov 112  }
  0x28   :  { %47 = vadd.xlane.f32.xlu0 %v46_v2  ;;  %v87_v16 = vld [vmem:[#allocation4 + $0x20] sm:$0xff]  ;;  %v1821_v17 = vpack.c.bf16 %v86_v15, %v85_v14  ;;  %v88_v18 = vld [vmem:[#allocation4 + $0x30] sm:$0xff]  ;;  %v1999_v26 = vshrl.u32 %v73_v22, 7  ;;  %1732 = vmatprep.mubr.msk.f32.mxu1 %vm1941_vm1, %v1940_v41  ;;  %s1944_s14 = smov 104   ;;  %s1945_s15 = smov 96   ;;  %vm186_vm2 = vcmask 64512  }
  0x29   :  { %v1825_v19 = vpack.c.bf16 %v88_v18, %v87_v16  ;;  %v2005_v29 = vld [vmem:[%s2207_s2] sm:$0x7]  ;;  %s1942_s2 = smov 120   ;;  %s1946_s16 = smov 64   ;;  %vm1526_vm3 = vcmask 130048   ;;  %vm1528_vm4 = vcmask 195584  }
  0x2a   :  { %1822 = vmatprep.subr.bf16.mxu0 %v1821_v17  ;;  %v75_v28 = vsub.s32 0, %v1999_v26  ;;  %v81_v30 = vsub.s32 1, %v1999_v26  ;;  %s1947_s17 = smov 24   ;;  %vm1559_vm5 = vcmask 1040384  }
  0x2b   :  { %1824 = vmatpush3.bf16.msra.mxu0 %v1821_v17 }
  0x2c   :  { %50 = vadd.xlane.f32.xlu0 %v49_v3  ;;  %1826 = vmatprep.subr.bf16.mxu0 %v1825_v19  ;;  %v76_v31 = vrot.slane %v2005_v29, %v75_v28  ;;  %v82_v34 = vrot.slane %v2005_v29, %v81_v30 }
  0x2f   :  { %1828 = vmatpush3.bf16.msra.mxu0 %v1825_v19 }
  0x30   :  { %1750 = vmatprep.subr.mxu0 %v1940_v41 }
  0xb5   :  { %v48_v4 = vpop.xlane.xlu0 %47 }
  0xb6   :  { %v53_v5 = vmul.f32 0.03125, %v48_v4 }
  0xb8   :  { %v55_v6 = vsub.f32 %v42_v0, %v53_v5 }
  0xb9   :  { %v51_v7 = vpop.xlane.xlu0 %50 }
  0xba   :  { %v54_v8 = vmul.f32 0.03125, %v51_v7  ;;  %v57_v9 = vmul.f32 %v55_v6, %v55_v6 }
  0xbc   :  { %v56_v10 = vsub.f32 %v43_v1, %v54_v8  ;;  %v59_v11 = vsel %vm45_vm0, %v57_v9, 0.0 }
  0xbd   :  { %60 = vadd.xlane.f32.xlu1 %v59_v11 }
  0xbe   :  { %v58_v12 = vmul.f32 %v56_v10, %v56_v10 }
  0xc0   :  { %v62_v13 = vsel %vm45_vm0, %v58_v12, 0.0 }
  0xc1   :  { %63 = vadd.xlane.f32.xlu1 %v62_v13 }
 0x14a   :  { %v61_v20 = vpop.xlane.xlu1 %60 }
 0x14b   :  { %v65_v21 = vmul.f32 0.03125, %v61_v20 }
 0x14d   :  { %v67_v23 = vadd.f32 1e-05, %v65_v21 }
 0x14e   :  { %v64_v24 = vpop.xlane.xlu1 %63 }
 0x14f   :  { %1850 = vrsqrt.f32 %v67_v23  ;;  %v66_v25 = vmul.f32 0.03125, %v64_v24 }
 0x151   :  { %v68_v27 = vadd.f32 1e-05, %v66_v25 }
 0x153   :  { %1852 = vrsqrt.f32 %v68_v27 }
 0x159   :  { %v1851_v32 = vpop.eup %1850 }
 0x15a   :  { %v71_v33 = vmul.f32 %v1851_v32, %v55_v6 }
 0x15c   :  { %v77_v35 = vmul.f32 %v76_v31, %v71_v33 }
 0x15d   :  { %v1853_v36 = vpop.eup %1852 }
 0x15e   :  { %v72_v37 = vmul.f32 %v1853_v36, %v56_v10  ;;  %v83_v38 = vadd.f32 %v82_v34, %v77_v35 }
 0x160   :  { %v78_v39 = vmul.f32 %v76_v31, %v72_v37  ;;  %1727 = vmatprep.mubr.msk.f32.mxu0 %vm45_vm0, %v83_v38 }
 0x162   :  { %v84_v40 = vadd.f32 %v82_v34, %v78_v39 }
 0x164   :  { %1728 = vmatmul.mubr.msk.f32.vlgmr.msra.gmra.mrb[0].mxu0 %vm45_vm0, %v84_v40 }
 0x165   :  { %1752 = vmatprep.mubr.msk.f32.mxu0 %vm1941_vm1, %v1940_v41 }
 0x237   :  { %v2018_v42 = vpop.f32.mrb[0].mxu0 }
 0x238   :  { %174 = vrot.lane.b32.xlu1 %v2018_v42, %s1942_s2  ;;  %v2021_v43 = vpop.f32.mrb[1].mxu0 }
 0x239   :  { %172 = vrot.lane.b32.xlu0 %v2021_v43, %s1942_s2 }
 0x23c   :  { %178 = vrot.lane.b32.xlu1 %v2018_v42, %s1943_s13 }
 0x23d   :  { %180 = vrot.lane.b32.xlu0 %v2021_v43, %s1944_s14 }
 0x240   :  { %176 = vrot.lane.b32.xlu1 %v2021_v43, %s1943_s13 }
 0x241   :  { %184 = vrot.lane.b32.xlu0 %v2021_v43, %s1945_s15 }
 0x244   :  { %182 = vrot.lane.b32.xlu1 %v2018_v42, %s1944_s14 }
 0x248   :  { %261 = vrot.lane.b32.xlu1 %v2018_v42, %s1945_s15 }
 0x2aa   :  { %v2030_v44 = vpop.permute.xlu1 %174 }
 0x2ab   :  { %413 = vrot.lane.b32.xlu1 %v2030_v44, %s1945_s15  ;;  %v173_v45 = vpop.permute.xlu0 %172 }
 0x2ac   :  { %337 = vrot.lane.b32.xlu0 %v173_v45, %s1945_s15 }
 0x2ae   :  { %v2033_v46 = vpop.permute.xlu1 %178 }
 0x2af   :  { %565 = vrot.lane.b32.xlu1 %v2033_v46, %s1945_s15  ;;  %v2036_v47 = vpop.permute.xlu0 %180 }
 0x2b2   :  { %v2038_v48 = vpop.permute.xlu1 %176 }
 0x2b3   :  { %489 = vrot.lane.b32.xlu0 %v2038_v48, %s1945_s15  ;;  %v185_v49 = vpop.permute.xlu0 %184 }
 0x2b4   :  { %1731 = vmatpush3.xpose.msk.msra.mxu1 %vm186_vm2, %v185_v49 }
 0x2b5   :  { %1735 = vmatprep.subr.mxu1 %v1940_v41 }
 0x2b6   :  { %v2043_v50 = vpop.permute.xlu1 %182 }
 0x2b7   :  { %717 = vrot.lane.b32.xlu1 %v2043_v50, %s1945_s15  ;;  %641 = vrot.lane.b32.xlu0 %v2036_v47, %s1945_s15 }
 0x2b8   :  { %1733 = vmatmul.mubr.msk.f32.vlgmr.msra.gmra.mrb[0].mxu1 %vm186_vm2, %v2021_v43 }
 0x2b9   :  { %1737 = vmatprep.mubr.msk.f32.mxu1 %vm1941_vm1, %v1940_v41 }
 0x2ba   :  { %v262_v51 = vpop.permute.xlu1 %261 }
 0x2bb   :  { %1736 = vmatpush3.xpose.msk.msra.mxu1 %vm186_vm2, %v262_v51 }
 0x2bc   :  { %1740 = vmatprep.subr.mxu1 %v1940_v41 }
 0x2be   :  { %1738 = vmatmul.mubr.msk.f32.vlgmr.msra.gmra.mrb[2].mxu1 %vm186_vm2, %v2018_v42 }
 0x2bf   :  { %1742 = vmatprep.mubr.msk.f32.mxu1 %vm1941_vm1, %v1940_v41 }
 0x31d   :  { %v414_v53 = vpop.permute.xlu1 %413 }
 0x31e   :  { %v338_v52 = vpop.permute.xlu0 %337 }
 0x31f   :  { %1741 = vmatpush3.xpose.msk.msra.mxu1 %vm186_vm2, %v338_v52 }
 0x320   :  { %1745 = vmatprep.subr.mxu1 %v1940_v41 }
 0x321   :  { %v566_v54 = vpop.permute.xlu1 %565 }
 0x322   :  { %1743 = vmatmul.mubr.msk.f32.vlgmr.msra.gmra.mrb[4].mxu1 %vm186_vm2, %v173_v45 }
 0x323   :  { %1746 = vmatpush3.xpose.msk.msra.mxu1 %vm186_vm2, %v414_v53  ;;  %1747 = vmatprep.mubr.msk.f32.mxu1 %vm1941_vm1, %v1940_v41 }
 0x324   :  { %1755 = vmatprep.subr.mxu1 %v1940_v41 }
 0x325   :  { %v490_v55 = vpop.permute.xlu0 %489 }
 0x326   :  { %1748 = vmatmul.mubr.msk.f32.vlgmr.msra.gmra.mrb[6].mxu1 %vm186_vm2, %v2030_v44  ;;  %1751 = vmatpush3.xpose.msk.msra.mxu0 %vm186_vm2, %v490_v55 }
 0x327   :  { %1756 = vmatpush3.xpose.msk.msra.mxu1 %vm186_vm2, %v566_v54  ;;  %1757 = vmatprep.mubr.msk.f32.mxu1 %vm1941_vm1, %v1940_v41 }
 0x328   :  { %1760 = vmatprep.subr.mxu0 %v1940_v41  ;;  %1765 = vmatprep.subr.mxu1 %v1940_v41 }
 0x329   :  { %v718_v56 = vpop.permute.xlu1 %717  ;;  %1753 = vmatmul.mubr.msk.f32.vlgmr.msra.gmra.mrb[2].mxu0 %vm186_vm2, %v2038_v48  ;;  %v642_v57 = vpop.permute.xlu0 %641 }
 0x32a   :  { %1758 = vmatmul.mubr.msk.f32.vlgmr.msra.gmra.mrb[8].mxu1 %vm186_vm2, %v2033_v46  ;;  %1761 = vmatpush3.xpose.msk.msra.mxu0 %vm186_vm2, %v642_v57 }
 0x32b   :  { %1766 = vmatpush3.xpose.msk.msra.mxu1 %vm186_vm2, %v718_v56  ;;  %1762 = vmatprep.mubr.msk.f32.mxu0 %vm1941_vm1, %v1940_v41 }
 0x32c   :  { %1767 = vmatprep.mubr.msk.f32.mxu1 %vm1941_vm1, %v1940_v41  ;;  %1775 = vmatprep.subr.mxu1 %v1940_v41 }
 0x32d   :  { %1763 = vmatmul.mubr.msk.f32.vlgmr.msra.gmra.mrb[4].mxu0 %vm186_vm2, %v2036_v47  ;;  %1770 = vmatprep.subr.mxu0 %v1940_v41 }
 0x32e   :  { %1768 = vmatmul.mubr.msk.f32.vlgmr.msra.gmra.mrb[10].mxu1 %vm186_vm2, %v2043_v50  ;;  %1772 = vmatprep.mubr.msk.f32.mxu0 %vm1941_vm1, %v1940_v41 }
 0x32f   :  { %1777 = vmatprep.mubr.msk.f32.mxu1 %vm1941_vm1, %v1940_v41 }
 0x38b   :  { %v257_v58 = vpop.f32.mrb[0].mxu1 }
 0x38c   :  { %v1734_v59 = vpop.f32.mrb[1].mxu1  ;;  %v793_v60 = vsel %vm186_vm2, %v257_v58, -inf }
 0x38d   :  { %794 = vmax.xlane.f32.xlu0 %v793_v60 }
 0x391   :  { %v333_v61 = vpop.f32.mrb[2].mxu1 }
 0x392   :  { %v1739_v62 = vpop.f32.mrb[3].mxu1  ;;  %v796_v63 = vsel %vm186_vm2, %v333_v61, -inf }
 0x393   :  { %797 = vmax.xlane.f32.xlu1 %v796_v63 }
 0x3a4   :  { %981 = vrot.lane.b32.xlu1 %v2018_v42, %s1946_s16 }
 0x3a8   :  { %1057 = vrot.lane.b32.xlu1 %v173_v45, %s1946_s16 }
 0x3f5   :  { %v409_v0 = vpop.f32.mrb[4].mxu1 }
 0x3f6   :  { %v1744_v1 = vpop.f32.mrb[5].mxu1  ;;  %v799_v2 = vsel %vm186_vm2, %v409_v0, -inf }
 0x3f7   :  { %800 = vmax.xlane.f32.xlu0 %v799_v2 }
 0x3f9   :  { %v485_v3 = vpop.f32.mrb[6].mxu1 }
 0x3fa   :  { %v1749_v4 = vpop.f32.mrb[7].mxu1  ;;  %v802_v5 = vsel %vm186_vm2, %v485_v3, -inf }
 0x3fb   :  { %803 = vmax.xlane.f32.xlu0 %v802_v5 }
 0x3fc   :  { %v561_v6 = vpop.f32.mrb[2].mxu0 }
 0x3fd   :  { %v1754_v7 = vpop.f32.mrb[3].mxu0  ;;  %v2099_v8 = vpop.f32.mrb[8].mxu1  ;;  %v805_v9 = vsel %vm186_vm2, %v561_v6, -inf }
 0x3fe   :  { %v1759_v10 = vpop.f32.mrb[9].mxu1  ;;  %v808_v11 = vsel %vm186_vm2, %v2099_v8, -inf }
 0x3ff   :  { %809 = vmax.xlane.f32.xlu1 %v808_v11  ;;  %806 = vmax.xlane.f32.xlu0 %v805_v9 }
 0x400   :  { %v713_v12 = vpop.f32.mrb[4].mxu0 }
 0x401   :  { %v1764_v13 = vpop.f32.mrb[5].mxu0  ;;  %v2104_v14 = vpop.f32.mrb[10].mxu1  ;;  %v811_v15 = vsel %vm186_vm2, %v713_v12, -inf }
 0x402   :  { %v1769_v16 = vpop.f32.mrb[11].mxu1  ;;  %v814_v17 = vsel %vm186_vm2, %v2104_v14, -inf }
 0x403   :  { %815 = vmax.xlane.f32.xlu1 %v814_v17  ;;  %812 = vmax.xlane.f32.xlu0 %v811_v15 }
 0x414   :  { %1133 = vrot.lane.b32.xlu1 %v2030_v44, %s1946_s16 }
 0x419   :  { %905 = vrot.lane.b32.xlu0 %v2021_v43, %s1946_s16 }
 0x41a   :  { %v795_v18 = vpop.xlane.xlu0 %794 }
 0x41b   :  { %v817_v20 = vsub.f32 %v257_v58, %v795_v18 }
 0x41d   :  { %v825_v23 = vmul.f32 1.442695, %v817_v20 }
 0x41f   :  { %1854 = vpow2.f32 %v825_v23 }
 0x420   :  { %v798_v19 = vpop.xlane.xlu1 %797 }
 0x421   :  { %v818_v21 = vsub.f32 %v333_v61, %v798_v19 }
 0x423   :  { %v827_v24 = vmul.f32 1.442695, %v818_v21 }
 0x424   :  { %v982_v22 = vpop.permute.xlu1 %981 }
 0x425   :  { %1776 = vmatpush3.msra.mxu1 %v982_v22  ;;  %1856 = vpow2.f32 %v827_v24 }
 0x426   :  { %1785 = vmatprep.subr.mxu1 %v1940_v41 }
 0x428   :  { %v1058_v57 = vpop.permute.xlu1 %1057 }
 0x429   :  { %v2114_v25 = vpop.eup %1854 }
 0x42a   :  { %v841_v30 = vsel %vm186_vm2, %v2114_v25, 0.0 }
 0x42f   :  { %v2116_v27 = vpop.eup %1856 }
 0x430   :  { %v844_v28 = vsel %vm186_vm2, %v2116_v27, 0.0 }
 0x438   :  { %845 = vadd.xlane.f32.xlu1 %v844_v28  ;;  %842 = vadd.xlane.f32.xlu0 %v841_v30 }
 0x484   :  { %v801_v31 = vpop.xlane.xlu0 %800 }
 0x485   :  { %v819_v32 = vsub.f32 %v409_v0, %v801_v31 }
 0x487   :  { %v829_v33 = vmul.f32 1.442695, %v819_v32 }
 0x488   :  { %v804_v34 = vpop.xlane.xlu0 %803 }
 0x489   :  { %1858 = vpow2.f32 %v829_v33  ;;  %v820_v35 = vsub.f32 %v485_v3, %v804_v34 }
 0x48b   :  { %v831_v36 = vmul.f32 1.442695, %v820_v35 }
 0x48c   :  { %v807_v37 = vpop.xlane.xlu0 %806  ;;  %v810_v58 = vpop.xlane.xlu1 %809 }
 0x48d   :  { %1860 = vpow2.f32 %v831_v36  ;;  %v821_v38 = vsub.f32 %v561_v6, %v807_v37  ;;  %v822_v59 = vsub.f32 %v2099_v8, %v810_v58 }
 0x48f   :  { %v833_v39 = vmul.f32 1.442695, %v821_v38  ;;  %v835_v61 = vmul.f32 1.442695, %v822_v59 }
 0x490   :  { %v813_v40 = vpop.xlane.xlu0 %812  ;;  %v816_v60 = vpop.xlane.xlu1 %815 }
 0x491   :  { %v823_v42 = vsub.f32 %v713_v12, %v813_v40  ;;  %1862 = vpow2.f32 %v833_v39  ;;  %v824_v62 = vsub.f32 %v2104_v14, %v816_v60 }
 0x493   :  { %v2122_v43 = vpop.eup %1858  ;;  %v837_v44 = vmul.f32 1.442695, %v823_v42  ;;  %v839_v63 = vmul.f32 1.442695, %v824_v62 }
 0x494   :  { %v906_v45 = vpop.permute.xlu0 %905  ;;  %v847_v49 = vsel %vm186_vm2, %v2122_v43, 0.0  ;;  %v1134_v0 = vpop.permute.xlu1 %1133 }
 0x495   :  { %848 = vadd.xlane.f32.xlu0 %v847_v49  ;;  %1771 = vmatpush3.msra.mxu0 %v906_v45  ;;  %1864 = vpow2.f32 %v837_v44 }
 0x496   :  { %1780 = vmatprep.subr.mxu0 %v1940_v41  ;;  %1866 = vpow2.f32 %v835_v61 }
 0x497   :  { %v2127_v51 = vpop.eup %1860  ;;  %1868 = vpow2.f32 %v839_v63 }
 0x498   :  { %v850_v52 = vsel %vm186_vm2, %v2127_v51, 0.0 }
 0x499   :  { %851 = vadd.xlane.f32.xlu1 %v850_v52 }
 0x49b   :  { %v2131_v53 = vpop.eup %1862 }
 0x49c   :  { %v853_v54 = vsel %vm186_vm2, %v2131_v53, 0.0 }
 0x49d   :  { %854 = vadd.xlane.f32.xlu0 %v853_v54 }
 0x49f   :  { %v2135_v55 = vpop.eup %1864 }
 0x4a0   :  { %v859_v56 = vsel %vm186_vm2, %v2135_v55, 0.0  ;;  %v2147_v2 = vpop.eup %1866 }
 0x4a1   :  { %860 = vadd.xlane.f32.xlu0 %v859_v56  ;;  %v2151_v3 = vpop.eup %1868 }
 0x4aa   :  { %1285 = vrot.lane.b32.xlu1 %v2033_v46, %s1946_s16 }
 0x4b7   :  { %1209 = vrot.lane.b32.xlu0 %v2038_v48, %s1946_s16  ;;  %v856_v48 = vsel %vm186_vm2, %v2147_v2, 0.0 }
 0x4bb   :  { %1361 = vrot.lane.b32.xlu0 %v2036_v47, %s1946_s16  ;;  %v862_v47 = vsel %vm186_vm2, %v2151_v3, 0.0 }
 0x4c5   :  { %v846_v1 = vpop.xlane.xlu1 %845  ;;  %v843_v46 = vpop.xlane.xlu0 %842 }
 0x4c6   :  { %1870 = vrcp.f32 %v846_v1 }
 0x4c7   :  { %1872 = vrcp.f32 %v843_v46 }
 0x4ce   :  { %857 = vadd.xlane.f32.xlu1 %v856_v48 }
 0x4d0   :  { %v1871_v4 = vpop.eup %1870 }
 0x4d1   :  { %v1873_v5 = vpop.eup %1872  ;;  %v874_v6 = vmul.f32 %v1871_v4, %v846_v1 }
 0x4d2   :  { %v873_v7 = vmul.f32 %v1873_v5, %v843_v46  ;;  %863 = vadd.xlane.f32.xlu1 %v862_v47 }
 0x4d3   :  { %v882_v8 = vsub.f32 2.0, %v874_v6  ;;  %v1562_v6 = vld [vmem:[#allocation4 + $0x18] sm:$0xff] }
 0x4d4   :  { %v881_v9 = vsub.f32 2.0, %v873_v7 }
 0x4d5   :  { %v890_v10 = vmul.f32 %v1871_v4, %v882_v8 }
 0x4d6   :  { %v889_v11 = vmul.f32 %v1873_v5, %v881_v9  ;;  %v1561_v5 = vld [vmem:[#allocation4 + $0x8] sm:$0xff]  ;;  %v1948_v9 = vmov 0.0|0.0  }
 0x4d7   :  { %v898_v12 = vmul.f32 %v2116_v27, %v890_v10  ;;  %v1830_v7 = vpack.c.bf16 %v1562_v6, %v1561_v5  ;;  %v1563_v10 = vld [vmem:[#allocation4 + $0x28] sm:$0xff] }
 0x4d8   :  { %v897_v13 = vmul.f32 %v2114_v25, %v889_v11  ;;  %v1564_v11 = vld [vmem:[#allocation4 + $0x38] sm:$0xff] }
 0x4d9   :  { %1778 = vmatmul.mubr.msk.f32.vlgmr.msra.gmra.mrb[12].mxu1 %vm186_vm2, %v898_v12 }
 0x4da   :  { %1773 = vmatmul.mubr.msk.f32.vlgmr.msra.gmra.mrb[6].mxu0 %vm186_vm2, %v897_v13  ;;  %1786 = vmatpush3.msra.mxu1 %v1134_v0  ;;  %v1833_v13 = vpack.c.bf16 %v1564_v11, %v1563_v10 }
 0x4db   :  { %1781 = vmatpush3.msra.mxu0 %v1058_v57  ;;  %1782 = vmatprep.mubr.msk.f32.mxu0 %vm1941_vm1, %v1940_v41 }
 0x4dc   :  { %1790 = vmatprep.subr.mxu0 %v1940_v41  ;;  %1787 = vmatprep.mubr.msk.f32.mxu1 %vm1941_vm1, %v1940_v41 }
 0x4dd   :  { %1795 = vmatprep.subr.mxu1 %v1940_v41 }
 0x4e3   :  { %1437 = vrot.lane.b32.xlu1 %v2043_v50, %s1946_s16 }
 0x522   :  { %v849_v14 = vpop.xlane.xlu0 %848 }
 0x523   :  { %1874 = vrcp.f32 %v849_v14 }
 0x526   :  { %v852_v15 = vpop.xlane.xlu1 %851 }
 0x527   :  { %1876 = vrcp.f32 %v852_v15 }
 0x52a   :  { %v855_v16 = vpop.xlane.xlu0 %854  ;;  %v1286_v34 = vpop.permute.xlu1 %1285 }
 0x52b   :  { %1878 = vrcp.f32 %v855_v16 }
 0x52d   :  { %v1875_v17 = vpop.eup %1874 }
 0x52e   :  { %v875_v18 = vmul.f32 %v1875_v17, %v849_v14  ;;  %v861_v19 = vpop.xlane.xlu0 %860 }
 0x52f   :  { %1880 = vrcp.f32 %v861_v19 }
 0x530   :  { %v883_v20 = vsub.f32 2.0, %v875_v18 }
 0x531   :  { %v1877_v21 = vpop.eup %1876 }
 0x532   :  { %v891_v22 = vmul.f32 %v1875_v17, %v883_v20  ;;  %v876_v23 = vmul.f32 %v1877_v21, %v852_v15  ;;  %v1210_v50 = vpop.permute.xlu0 %1209 }
 0x534   :  { %v899_v24 = vmul.f32 %v2122_v43, %v891_v22  ;;  %v884_v25 = vsub.f32 2.0, %v876_v23 }
 0x535   :  { %v1879_v27 = vpop.eup %1878 }
 0x536   :  { %v892_v28 = vmul.f32 %v1877_v21, %v884_v25  ;;  %1783 = vmatmul.mubr.msk.f32.vlgmr.msra.gmra.mrb[8].mxu0 %vm186_vm2, %v899_v24  ;;  %v877_v30 = vmul.f32 %v1879_v27, %v855_v16  ;;  %v1362_v40 = vpop.permute.xlu0 %1361 }
 0x537   :  { %1791 = vmatpush3.msra.mxu0 %v1210_v50  ;;  %1792 = vmatprep.mubr.msk.f32.mxu0 %vm1941_vm1, %v1940_v41 }
 0x538   :  { %v900_v31 = vmul.f32 %v2127_v51, %v892_v28  ;;  %1800 = vmatprep.subr.mxu0 %v1940_v41  ;;  %v885_v32 = vsub.f32 2.0, %v877_v30 }
 0x539   :  { %v1881_v33 = vpop.eup %1880 }
 0x53a   :  { %1788 = vmatmul.mubr.msk.f32.vlgmr.msra.gmra.mrb[14].mxu1 %vm186_vm2, %v900_v31  ;;  %v893_v35 = vmul.f32 %v1879_v27, %v885_v32  ;;  %v879_v36 = vmul.f32 %v1881_v33, %v861_v19 }
 0x53b   :  { %1796 = vmatpush3.msra.mxu1 %v1286_v34  ;;  %1797 = vmatprep.mubr.msk.f32.mxu1 %vm1941_vm1, %v1940_v41 }
 0x53c   :  { %1805 = vmatprep.subr.mxu1 %v1940_v41  ;;  %v901_v37 = vmul.f32 %v2131_v53, %v893_v35  ;;  %v887_v38 = vsub.f32 2.0, %v879_v36 }
 0x53e   :  { %v895_v39 = vmul.f32 %v1881_v33, %v887_v38  ;;  %1793 = vmatmul.mubr.msk.f32.vlgmr.msra.gmra.mrb[10].mxu0 %vm186_vm2, %v901_v37 }
 0x53f   :  { %1801 = vmatpush3.msra.mxu0 %v1362_v40  ;;  %1802 = vmatprep.mubr.msk.f32.mxu0 %vm1941_vm1, %v1940_v41 }
 0x540   :  { %v903_v42 = vmul.f32 %v2135_v55, %v895_v39  ;;  %1829 = vmatprep.subr.bf16.mxu0 %v1948_v9 }
 0x542   :  { %1803 = vmatmul.mubr.msk.f32.vlgmr.msra.gmra.mrb[12].mxu0 %vm186_vm2, %v903_v42 }
 0x543   :  { %1818 = vmatprep.mubr.msk.f32.mxu0 %vm1941_vm1, %v1940_v41  ;;  %1831 = vmatpush3.bf16.msra.mxu0 %v1830_v7 }
 0x544   :  { %1832 = vmatprep.subr.bf16.mxu0 %v1948_v9 }
 0x547   :  { %1834 = vmatpush3.bf16.msra.mxu0 %v1833_v13 }
 0x55b   :  { %v858_v43 = vpop.xlane.xlu1 %857 }
 0x55c   :  { %1882 = vrcp.f32 %v858_v43 }
 0x55f   :  { %v864_v44 = vpop.xlane.xlu1 %863 }
 0x560   :  { %1884 = vrcp.f32 %v864_v44 }
 0x563   :  { %v1438_v55 = vpop.permute.xlu1 %1437 }
 0x566   :  { %v1883_v45 = vpop.eup %1882 }
 0x567   :  { %v878_v49 = vmul.f32 %v1883_v45, %v858_v43 }
 0x569   :  { %v886_v51 = vsub.f32 2.0, %v878_v49 }
 0x56a   :  { %v1885_v52 = vpop.eup %1884 }
 0x56b   :  { %v894_v53 = vmul.f32 %v1883_v45, %v886_v51  ;;  %v880_v54 = vmul.f32 %v1885_v52, %v864_v44  ;;  %v1567_v44 = vsub.s32 2, %v1999_v26 }
 0x56d   :  { %v902_v56 = vmul.f32 %v2147_v2, %v894_v53  ;;  %v888_v57 = vsub.f32 2.0, %v880_v54  ;;  %v1568_v45 = vrot.slane %v2005_v29, %v1567_v44 }
 0x56f   :  { %v896_v58 = vmul.f32 %v1885_v52, %v888_v57  ;;  %1798 = vmatmul.mubr.msk.f32.vlgmr.msra.gmra.mrb[16].mxu1 %vm186_vm2, %v902_v56 }
 0x570   :  { %1806 = vmatpush3.msra.mxu1 %v1438_v55  ;;  %1807 = vmatprep.mubr.msk.f32.mxu1 %vm1941_vm1, %v1940_v41 }
 0x571   :  { %v904_v59 = vmul.f32 %v2151_v3, %v896_v58 }
 0x573   :  { %1808 = vmatmul.mubr.msk.f32.vlgmr.msra.gmra.mrb[18].mxu1 %vm186_vm2, %v904_v59 }
 0x5ac   :  { %v1053_v60 = vpop.f32.mrb[12].mxu1 }
 0x5ad   :  { %v977_v61 = vpop.f32.mrb[6].mxu0  ;;  %v1779_v62 = vpop.f32.mrb[13].mxu1 }
 0x5ae   :  { %v1774_v63 = vpop.f32.mrb[7].mxu0 }
 0x609   :  { %v1129_v0 = vpop.f32.mrb[8].mxu0 }
 0x60a   :  { %1514 = vrot.lane.b32.xlu0 %v1129_v0, %s1936_s23  ;;  %v1784_v1 = vpop.f32.mrb[9].mxu0 }
 0x60d   :  { %v1205_v46 = vpop.f32.mrb[14].mxu1 }
 0x60e   :  { %1538 = vrot.lane.b32.xlu1 %v1205_v46, %s1936_s23  ;;  %v1789_v2 = vpop.f32.mrb[15].mxu1 }
 0x611   :  { %v1281_v48 = vpop.f32.mrb[10].mxu0 }
 0x612   :  { %1518 = vrot.lane.b32.xlu0 %v1281_v48, %s1939_s9  ;;  %v1794_v41 = vpop.f32.mrb[11].mxu0 }
 0x615   :  { %v1433_v4 = vpop.f32.mrb[12].mxu0 }
 0x616   :  { %1522 = vrot.lane.b32.xlu0 %v1433_v4, %s1947_s17  ;;  %v1804_v3 = vpop.f32.mrb[13].mxu0 }
 0x642   :  { %v1357_v47 = vpop.f32.mrb[16].mxu1 }
 0x643   :  { %1542 = vrot.lane.b32.xlu1 %v1357_v47, %s1939_s9  ;;  %v1799_v8 = vpop.f32.mrb[17].mxu1 }
 0x646   :  { %v1509_v12 = vpop.f32.mrb[18].mxu1 }
 0x647   :  { %1546 = vrot.lane.b32.xlu1 %v1509_v12, %s1947_s17  ;;  %v1809_v14 = vpop.f32.mrb[19].mxu1 }
 0x67c   :  { %v1515_v15 = vpop.permute.xlu0 %1514 }
 0x67d   :  { %v1525_v18 = vsel %vm186_vm2, %v977_v61, %v1515_v15 }
 0x680   :  { %v1539_v22 = vpop.permute.xlu1 %1538 }
 0x681   :  { %v1549_v27 = vsel %vm186_vm2, %v1053_v60, %v1539_v22 }
 0x684   :  { %v1519_v16 = vpop.permute.xlu0 %1518 }
 0x685   :  { %v1527_v19 = vsel %vm1526_vm3, %v1525_v18, %v1519_v16 }
 0x688   :  { %v1523_v17 = vpop.permute.xlu0 %1522 }
 0x689   :  { %v1529_v20 = vsel %vm1528_vm4, %v1527_v19, %v1523_v17 }
 0x68a   :  { %v1530_v21 = vsel %vm45_vm0, %v1529_v20, -inf }
 0x68b   :  { %v1531_v23 = vrot.slane %v1530_v21, 4 }
 0x68d   :  { %v1532_v25 = vmax.f32 %v1530_v21, %v1531_v23 }
 0x68f   :  { %v1533_v30 = vrot.slane %v1532_v25, 2 }
 0x691   :  { %v1534_v34 = vmax.f32 %v1532_v25, %v1533_v30 }
 0x693   :  { %v1535_v37 = vrot.slane %v1534_v34, 1 }
 0x695   :  { %v1536_v40 = vmax.f32 %v1534_v34, %v1535_v37 }
 0x6b5   :  { %v1543_v24 = vpop.permute.xlu1 %1542 }
 0x6b6   :  { %v1550_v28 = vsel %vm1526_vm3, %v1549_v27, %v1543_v24 }
 0x6b9   :  { %v1547_v50 = vpop.permute.xlu1 %1546 }
 0x6ba   :  { %v1551_v31 = vsel %vm1528_vm4, %v1550_v28, %v1547_v50 }
 0x6bb   :  { %v1552_v32 = vsel %vm45_vm0, %v1551_v31, -inf }
 0x6bc   :  { %v1553_v33 = vrot.slane %v1552_v32, 4 }
 0x6be   :  { %v1554_v35 = vmax.f32 %v1552_v32, %v1553_v33 }
 0x6c0   :  { %v1555_v36 = vrot.slane %v1554_v35, 2 }
 0x6c2   :  { %v1556_v38 = vmax.f32 %v1554_v35, %v1555_v36 }
 0x6c4   :  { %v1557_v39 = vrot.slane %v1556_v38, 1 }
 0x6c6   :  { %v1558_v42 = vmax.f32 %v1556_v38, %v1557_v39 }
 0x6c8   :  { %v1560_v43 = vsel %vm1559_vm5, %v1536_v40, %v1558_v42 }
 0x6c9   :  { %1819 = vmatmul.mubr.msk.f32.vlgmr.msra.gmra.mrb[14].mxu0 %vm45_vm0, %v1560_v43 }
 0x79c   :  { %v1638_v49 = vpop.f32.mrb[14].mxu0 }
 0x79d   :  { %v1639_v51 = vadd.f32 %v1638_v49, %v1568_v45  ;;  %v1820_v52 = vpop.f32.mrb[15].mxu0 }
 0x79f   :  { %1642 = vst [vmem:[%s2208_s3] sm:$0x3] %v1639_v51 }
 0x7a0   :  { %1647 = vsyncpa [#allocation3], 1 }
 0x7a1   :  { %1648 = vsyncpa [#allocation5], 1 }

</bundles_post_ra>
